<compile_context>
chip_gen: v5e
topology: v5e:2x2
jax: 0.10.0
libtpu: 0.0.40
codegen_flags: <defaults>
</compile_context>

<pallas_src>
import functools

import jax
import jax.numpy as jnp
from jax.experimental import pallas as pl
from jax.experimental.pallas import tpu as pltpu


def _round_up(a, b):
    return ((a + b - 1) // b) * b


# ----------------------------------------------------------------------------
# Pallas kernel: fused  a   = relu([Wg|Wx] @ [g;x] + (bg+bx))
#                       psi = sigmoid(wp . a + bp)
#                       out = x * psi
# Channels on the sublane axis, flattened spatial on the lane (last) axis ->
# lane-dense loads / unmasked lane-dense stores even though F_g/F_l are tiny.
# ----------------------------------------------------------------------------
def attention_block_kernel(g_ref, x_ref, wgx_ref, b_ref, wp_ref, bp_ref, o_ref):
    # g_ref: (1, F_g, T)   x_ref: (1, F_l, T)   o_ref: (1, F_l, T)
    # wgx_ref: (F_int, F_g+F_l)   b_ref: (F_int, 1)
    # wp_ref:  (F_int, 1)         bp_ref: (1, 1)
    x = x_ref[0].astype(jnp.float32)                                  # (F_l, T)
    gx = jnp.concatenate([g_ref[0].astype(jnp.float32), x], axis=0)   # (K, T)

    # Single K=(F_g+F_l) MXU matmul; BN + both conv biases pre-folded.
    a = jnp.dot(wgx_ref[...], gx,
                preferred_element_type=jnp.float32) + b_ref[...]      # (F_int, T)
    a = jnp.maximum(a, 0.0)                                           # ReLU

    # psi projection: output width 1 -> VPU broadcast-mul + sublane reduce
    # (don't waste an MXU pass on an N=1 matmul); sigmoid on the EUP.
    psi = jnp.sum(a * wp_ref[...], axis=0, keepdims=True) + bp_ref[...]  # (1, T)
    psi = jax.nn.sigmoid(psi)

    o_ref[0] = (x * psi).astype(o_ref.dtype)                          # lane-dense store


def _pick_tile(S, tile_cap):
    """Pick the lane-tile for the flattened spatial axis.

    Prefers exact tilings (no padding, no partial blocks):
      * whole-S tile when it fits under the cap (full-extent blocks are legal
        even when S is not a multiple of 128),
      * else the largest multiple-of-128 divisor of S that is <= cap.
    Only when S is large and has no usable divisor structure do we fall back
    to a ragged cdiv grid (Pallas drops OOB writes of the boundary block).
    """
    cap = max(128, _round_up(min(int(tile_cap), 65536), 128))
    if _round_up(S, 128) <= cap:
        return S                         # single full-extent spatial tile
    if S % 128 == 0:
        t = cap
        while t >= min(cap, 4096):
            if S % t == 0:
                return t                 # exact tiling, zero padded lanes
            t -= 128
    # Pathological shape: ragged boundary block (rare for 3D U-Net volumes).
    return cap


def attention_block_pallas(g3, x3, wgx, b, wp, bp, *, tile_s=32768):
    """g3: (N, F_g, S), x3: (N, F_l, S). Returns (N, F_l, S) in x3.dtype."""
    N, F_g, S = g3.shape
    F_l = x3.shape[1]
    F_int = wgx.shape[0]

    tile = _pick_tile(S, tile_s)
    grid = (N, pl.cdiv(S, tile))
    # NOTE(v7x): with 2 TensorCores, keep grid >= ~8 steps for big volumes by
    # lowering tile_s if N * (S/tile) would otherwise starve one core.

    def tile_spec(C):
        return pl.BlockSpec((1, C, tile), lambda n, s: (n, 0, s))

    def full_spec(r, c):
        return pl.BlockSpec((r, c), lambda n, s: (0, 0))

    # VMEM budget: 3 I/O blocks (4-sublane blocks pad to 8 sublanes in VMEM),
    # double-buffered, plus f32 intermediates.  Request it explicitly so the
    # larger tiles fit v5e's 16 MiB scoped default and stay well inside v7x's
    # 64 MiB physical VMEM.
    blk = 8 * tile * 4
    vmem_limit = int(min(48 << 20, max(32 << 20, 20 * blk)))

    # Advisory cost for XLA's scheduler (HBM-bound op).
    cost = pl.CostEstimate(
        flops=int(N * S * (2 * F_int * (F_g + F_l) + 4 * F_int + F_l + 2)),
        transcendentals=int(N * S),
        bytes_accessed=int(g3.size * g3.dtype.itemsize
                           + 2 * x3.size * x3.dtype.itemsize),
    )

    return pl.pallas_call(
        attention_block_kernel,
        out_shape=jax.ShapeDtypeStruct((N, F_l, S), x3.dtype),
        grid_spec=pl.GridSpec(
            grid=grid,
            in_specs=[
                tile_spec(F_g),               # g tile   (1, F_g, tile)
                tile_spec(F_l),               # x tile   (1, F_l, tile)
                full_spec(F_int, F_g + F_l),  # [Wg | Wx]       (BN folded)
                full_spec(F_int, 1),          # bg + bx         (BN folded)
                full_spec(F_int, 1),          # psi weight col  (BN folded)
                full_spec(1, 1),              # psi bias
            ],
            out_specs=tile_spec(F_l),
        ),
        compiler_params=pltpu.CompilerParams(
            dimension_semantics=("parallel", "parallel"),
            vmem_limit_bytes=vmem_limit),
        cost_estimate=cost,
    )(g3, x3, wgx, b, wp, bp)


# ----------------------------------------------------------------------------
# Parameter construction (deterministic), BN folding, wrapper glue
# ----------------------------------------------------------------------------
def fold_conv_bn(w, b, gamma, beta, mean, var, eps=1e-5):
    """Fold eval-mode BatchNorm into a 1x1x1 conv.

    w: (C_out, C_in)  b: (C_out,)  BN params: (C_out,)
    Returns (w_folded (C_out, C_in), b_folded (C_out, 1)) for y = W @ x + b
    with x laid out (C_in, spatial).
    """
    scale = gamma / jnp.sqrt(var + eps)              # (C_out,)
    w_f = w * scale[:, None]                         # (C_out, C_in)
    b_f = beta + (b - mean) * scale                  # (C_out,)
    return jnp.asarray(w_f), b_f[:, None]


def make_params(key, F_g, F_l, F_int):
    ks = jax.random.split(key, 9)
    p = {}
    # conv weights (C_out, C_in) for 1x1x1 kernels, biases (C_out,)
    p["wg_w"] = jax.random.normal(ks[0], (F_int, F_g), jnp.float32) * 0.2
    p["wg_b"] = jax.random.normal(ks[1], (F_int,), jnp.float32) * 0.1
    p["wx_w"] = jax.random.normal(ks[2], (F_int, F_l), jnp.float32) * 0.2
    p["wx_b"] = jax.random.normal(ks[3], (F_int,), jnp.float32) * 0.1
    p["wp_w"] = jax.random.normal(ks[4], (1, F_int), jnp.float32) * 0.2
    p["wp_b"] = jax.random.normal(ks[5], (1,), jnp.float32) * 0.1

    # BatchNorm params (eval-mode running stats + affine)
    def bn(k, c):
        k1, k2, k3, k4 = jax.random.split(k, 4)
        return dict(
            gamma=1.0 + 0.1 * jax.random.normal(k1, (c,), jnp.float32),
            beta=0.1 * jax.random.normal(k2, (c,), jnp.float32),
            mean=0.1 * jax.random.normal(k3, (c,), jnp.float32),
            var=jnp.abs(1.0 + 0.1 * jax.random.normal(k4, (c,), jnp.float32)),
        )
    p["bn_g"] = bn(ks[6], F_int)
    p["bn_x"] = bn(ks[7], F_int)
    p["bn_p"] = bn(ks[8], 1)
    return p


@functools.partial(jax.jit, static_argnames=("tile_s",))
def attention_block_forward(g, x, params, tile_s=32768):
    """g: (N, F_g, D, H, W), x: (N, F_l, D, H, W) -> (N, F_l, D, H, W).

    Any float I/O dtype works (e.g. bfloat16 for ~2x HBM-traffic savings);
    compute is f32 in-kernel and the output dtype follows x.
    """
    N, F_g, D, H, W = g.shape
    F_l = x.shape[1]
    S = D * H * W

    wg, bg = fold_conv_bn(params["wg_w"], params["wg_b"], **params["bn_g"])
    wx, bx = fold_conv_bn(params["wx_w"], params["wx_b"], **params["bn_x"])
    wp, bp = fold_conv_bn(params["wp_w"], params["wp_b"], **params["bn_p"])

    wgx = jnp.concatenate([wg, wx], axis=1)          # (F_int, F_g+F_l)
    b = bg + bx                                      # (F_int, 1) fused bias
    wp_col = wp.T                                    # (F_int, 1)

    # NCDHW is channel-major already -> pure reshape, no HBM transpose.
    g3 = g.reshape(N, F_g, S)
    x3 = x.reshape(N, F_l, S)
    out3 = attention_block_pallas(g3, x3, wgx, b, wp_col, bp, tile_s=tile_s)
    return out3.reshape(N, F_l, D, H, W)


def reference_forward(g, x, params, eps=1e-5):
    """Pure-JAX reference (unfused conv + eval-mode BN), for verification."""
    def conv_bn(t, w, b, bn):
        y = jnp.einsum("oi,nidhw->nodhw", w, t) + b[None, :, None, None, None]
        scale = bn["gamma"] / jnp.sqrt(bn["var"] + eps)
        return ((y - bn["mean"][None, :, None, None, None])
                * scale[None, :, None, None, None]
                + bn["beta"][None, :, None, None, None])

    g1 = conv_bn(g, params["wg_w"], params["wg_b"], params["bn_g"])
    x1 = conv_bn(x, params["wx_w"], params["wx_b"], params["bn_x"])
    a = jnp.maximum(g1 + x1, 0.0)
    psi = jax.nn.sigmoid(conv_bn(a, params["wp_w"], params["wp_b"],
                                 params["bn_p"]))
    return x * psi


if __name__ == "__main__":
    # Small shapes consistent with the module: N=2, F_g=F_l=4, F_int=8.
    N, F_g, F_l, F_int = 2, 4, 4, 8

    key = jax.random.PRNGKey(0)
    k_g, k_x, k_p = jax.random.split(key, 3)
    params = make_params(k_p, F_g, F_l, F_int)

    def run_case(dhw, dtype=jnp.float32, tile_s=32768, atol=1e-4, rtol=1e-4):
        D, H, W = dhw
        kg, kx = jax.random.split(jax.random.fold_in(k_g, D * H * W), 2)
        g = jax.random.normal(kg, (N, F_g, D, H, W), jnp.float32)
        x = jax.random.normal(kx, (N, F_l, D, H, W), jnp.float32)
        out = attention_block_forward(g.astype(dtype), x.astype(dtype),
                                      params, tile_s=tile_s)
        out = jax.block_until_ready(out)
        ref = reference_forward(g, x, params)
        assert out.shape == ref.shape
        assert jnp.allclose(out.astype(jnp.float32), ref, atol=atol, rtol=rtol), \
            f"mismatch vs reference for dhw={dhw} dtype={dtype} tile_s={tile_s}"

    # f32, S=512: single whole-S spatial tile (no padding).
    run_case((8, 8, 8))
    # bf16 I/O path (f32 compute in-kernel): looser tolerance.
    run_case((8, 8, 8), dtype=jnp.bfloat16, atol=5e-2, rtol=5e-2)
    # Multi-step spatial grid: S=1024, tile=256 divides exactly (no padding).
    run_case((8, 8, 16), tile_s=256)
    # S=648 (not a multiple of 128): single full-extent tile, still no padding.
    run_case((9, 9, 8))

    print("KERNEL_OK")
</pallas_src>

<mosaic_0001>
module attributes {stable_mosaic.version = 11 : i64} {
  func.func @attention_block_kernel(%arg0: i32, %arg1: i32, %arg2: memref<1x4x512xf32, #tpu.memory_space<vmem>>, %arg3: memref<1x4x512xf32, #tpu.memory_space<vmem>>, %arg4: memref<8x8xf32, #tpu.memory_space<vmem>>, %arg5: memref<8x1xf32, #tpu.memory_space<vmem>>, %arg6: memref<8x1xf32, #tpu.memory_space<vmem>>, %arg7: memref<1x1xf32, #tpu.memory_space<vmem>>, %arg8: memref<1x4x512xf32, #tpu.memory_space<vmem>>) attributes {dimension_semantics = [#tpu.dimension_semantics<parallel>, #tpu.dimension_semantics<parallel>], iteration_bounds = array<i64: 2, 1>, scalar_prefetch = 0 : i64, scratch_operands = 0 : i64, tpu.core_type = #tpu.core_type<tc>, window_params = [{transform_indices = @transform_0, window_bounds = array<i64: 1, 4, 512>}, {transform_indices = @transform_1, window_bounds = array<i64: 1, 4, 512>}, {pipeline_mode = #tpu.pipeline_mode<synchronous>, transform_indices = @transform_2, window_bounds = array<i64: 8, 8>}, {pipeline_mode = #tpu.pipeline_mode<synchronous>, transform_indices = @transform_3, window_bounds = array<i64: 8, 1>}, {pipeline_mode = #tpu.pipeline_mode<synchronous>, transform_indices = @transform_4, window_bounds = array<i64: 8, 1>}, {pipeline_mode = #tpu.pipeline_mode<synchronous>, transform_indices = @transform_5, window_bounds = array<i64: 1, 1>}, {transform_indices = @transform_6, window_bounds = array<i64: 1, 4, 512>}]} {
    %c0 = arith.constant 0 : index
    %c0_0 = arith.constant 0 : index
    %c0_1 = arith.constant 0 : index
    %0 = vector.load %arg3[%c0, %c0_0, %c0_1] : memref<1x4x512xf32, #tpu.memory_space<vmem>>, vector<1x4x512xf32>
    %1 = vector.shape_cast %0 : vector<1x4x512xf32> to vector<4x512xf32>
    %c0_2 = arith.constant 0 : index
    %c0_3 = arith.constant 0 : index
    %c0_4 = arith.constant 0 : index
    %2 = vector.load %arg2[%c0_2, %c0_3, %c0_4] : memref<1x4x512xf32, #tpu.memory_space<vmem>>, vector<1x4x512xf32>
    %3 = vector.shape_cast %2 : vector<1x4x512xf32> to vector<4x512xf32>
    %4 = tpu.concatenate %3, %1 in 0 : vector<4x512xf32>, vector<4x512xf32> -> vector<8x512xf32>
    %c0_5 = arith.constant 0 : index
    %c0_6 = arith.constant 0 : index
    %5 = vector.load %arg4[%c0_5, %c0_6] : memref<8x8xf32, #tpu.memory_space<vmem>>, vector<8x8xf32>
    %cst = arith.constant dense<0.000000e+00> : vector<8x512xf32>
    %6 = tpu.matmul %5, %4, %cst {dimension_numbers = #tpu.dot_dimension_numbers<[1], [0], [0], [1], [0, 0, 1, 1], [], []>} : vector<8x8xf32>, vector<8x512xf32>, vector<8x512xf32> -> vector<8x512xf32>
    %c0_7 = arith.constant 0 : index
    %c0_8 = arith.constant 0 : index
    %7 = vector.load %arg5[%c0_7, %c0_8] : memref<8x1xf32, #tpu.memory_space<vmem>>, vector<8x1xf32>
    %8 = vector.broadcast %7 : vector<8x1xf32> to vector<8x512xf32>
    %9 = arith.addf %6, %8 : vector<8x512xf32>
    %cst_9 = arith.constant 0.000000e+00 : f32
    %10 = vector.broadcast %cst_9 : f32 to vector<8x512xf32>
    %11 = arith.maximumf %9, %10 : vector<8x512xf32>
    %c0_10 = arith.constant 0 : index
    %c0_11 = arith.constant 0 : index
    %12 = vector.load %arg6[%c0_10, %c0_11] : memref<8x1xf32, #tpu.memory_space<vmem>>, vector<8x1xf32>
    %13 = vector.broadcast %12 : vector<8x1xf32> to vector<8x512xf32>
    %14 = arith.mulf %11, %13 : vector<8x512xf32>
    %cst_12 = arith.constant dense<0.000000e+00> : vector<512xf32>
    %15 = vector.multi_reduction <add>, %14, %cst_12 [0] : vector<8x512xf32> to vector<512xf32>
    %16 = vector.shape_cast %15 : vector<512xf32> to vector<1x512xf32>
    %c0_13 = arith.constant 0 : index
    %c0_14 = arith.constant 0 : index
    %17 = vector.load %arg7[%c0_13, %c0_14] : memref<1x1xf32, #tpu.memory_space<vmem>>, vector<1x1xf32>
    %18 = vector.broadcast %17 : vector<1x1xf32> to vector<1x512xf32>
    %19 = arith.addf %16, %18 : vector<1x512xf32>
    %20 = arith.negf %19 : vector<1x512xf32>
    %21 = math.exp %20 : vector<1x512xf32>
    %cst_15 = arith.constant 1.000000e+00 : f32
    %22 = vector.broadcast %cst_15 : f32 to vector<1x512xf32>
    %23 = arith.addf %22, %21 : vector<1x512xf32>
    %24 = arith.divf %22, %23 : vector<1x512xf32>
    %25 = vector.broadcast %24 : vector<1x512xf32> to vector<4x512xf32>
    %26 = arith.mulf %1, %25 : vector<4x512xf32>
    %c0_16 = arith.constant 0 : index
    %c0_17 = arith.constant 0 : index
    %c0_18 = arith.constant 0 : index
    %27 = vector.load %arg8[%c0_16, %c0_17, %c0_18] : memref<1x4x512xf32, #tpu.memory_space<vmem>>, vector<1x4x512xf32>
    %28 = vector.shape_cast %27 : vector<1x4x512xf32> to vector<4x512xf32>
    %29 = vector.shape_cast %26 : vector<4x512xf32> to vector<1x4x512xf32>
    tpu.vector_store %arg8[%c0_16, %c0_17, %c0_18], %29 {strides = array<i32>} : memref<1x4x512xf32, #tpu.memory_space<vmem>>, vector<1x4x512xf32>,
    return
  }
  func.func @transform_0(%arg0: i32, %arg1: i32) -> (i32, i32, i32) {
    %c0_i32 = arith.constant 0 : i32
    %c0_i32_0 = arith.constant 0 : i32
    return %arg0, %c0_i32, %arg1 : i32, i32, i32
  }
  func.func @transform_1(%arg0: i32, %arg1: i32) -> (i32, i32, i32) {
    %c0_i32 = arith.constant 0 : i32
    %c0_i32_0 = arith.constant 0 : i32
    return %arg0, %c0_i32, %arg1 : i32, i32, i32
  }
  func.func @transform_2(%arg0: i32, %arg1: i32) -> (i32, i32) {
    %c0_i32 = arith.constant 0 : i32
    %c0_i32_0 = arith.constant 0 : i32
    %c0_i32_1 = arith.constant 0 : i32
    return %c0_i32, %c0_i32_0 : i32, i32
  }
  func.func @transform_3(%arg0: i32, %arg1: i32) -> (i32, i32) {
    %c0_i32 = arith.constant 0 : i32
    %c0_i32_0 = arith.constant 0 : i32
    %c0_i32_1 = arith.constant 0 : i32
    return %c0_i32, %c0_i32_0 : i32, i32
  }
  func.func @transform_4(%arg0: i32, %arg1: i32) -> (i32, i32) {
    %c0_i32 = arith.constant 0 : i32
    %c0_i32_0 = arith.constant 0 : i32
    %c0_i32_1 = arith.constant 0 : i32
    return %c0_i32, %c0_i32_0 : i32, i32
  }
  func.func @transform_5(%arg0: i32, %arg1: i32) -> (i32, i32) {
    %c0_i32 = arith.constant 0 : i32
    %c0_i32_0 = arith.constant 0 : i32
    %c0_i32_1 = arith.constant 0 : i32
    return %c0_i32, %c0_i32_0 : i32, i32
  }
  func.func @transform_6(%arg0: i32, %arg1: i32) -> (i32, i32, i32) {
    %c0_i32 = arith.constant 0 : i32
    %c0_i32_0 = arith.constant 0 : i32
    return %arg0, %c0_i32, %arg1 : i32, i32, i32
  }
}

</mosaic_0001>

<bundles_post_ra>
// kernel: attention_block_forward.1
= control target key start
LH: loop header
LB: loop body
LE: loop exit
PB: predicated region body
PF: predicated region fallthrough
CT: control target
= control target key end

     0   :  { %s830_s23 = smov 0   ;;  %s832_s24 = smov 0   ;;  %s911_s0 = inlined_call_operand.vmem [shape: f32[2,4,512], index: 0, kind: input, shape index: {}]   ;;  %s912_s1 = inlined_call_operand.vmem [shape: f32[2,4,512], index: 1, kind: input, shape index: {}]   ;;  %s913_s2 = inlined_call_operand.vmem [shape: f32[8,8], index: 2, kind: input, shape index: {}]   ;;  %s914_s3 = inlined_call_operand.vmem [shape: f32[8,1], index: 3, kind: input, shape index: {}]   ;;  %s915_s4 = inlined_call_operand.vmem [shape: f32[8,1], index: 4, kind: input, shape index: {}]   ;;  %s916_s5 = inlined_call_operand.<no memory space> [shape: f32[1,1], index: 5, kind: input, shape index: {}]   ;;  %s917_s6 = inlined_call_operand.vmem [shape: f32[2,4,512], index: 6, kind: output, shape index: {}]  }
   0x1   :  { %v11_v0 = vstv %s916_s5  ;;  %s834_s25 = smov 0  }
   0x2   :  { %12 = vst [vmem:[#allocation2] sm:$0x1] %v11_v0 }
   0x3 LB: > { %s30_s5 = sadd.s32 1, %s785_s24  ;;  %p704_p0 = scmp.ge.s32.totalorder %s789_s25, 1  ;;  %s789_s25 = sphi %s834_s25, %s18_s25   ;;  %s785_s24 = sphi %s832_s24, %s921_s24   ;;  %s781_s23 = sphi %s830_s23, %s920_s23  }
   0x4   : > { %p32_p1 = scmp.ge.s32.totalorder %s30_s5, 2  ;;  %p252_p2 = scmp.lt.s32.totalorder %s789_s25, 3 }
   0x6   : > { %s923_s5 = smov (%p32_p1, %s30_s5), 0  ;;  %p253_p3 = pnand %p704_p0, %p252_p2 }
   0x7   : > { %p300_p4 = scmp.lt.s32.totalorder (!%p253_p3), %s781_s23, 1 }
   0x8   : > { %256 = sbr.rel (%p253_p3) target bundleno = 224 (0xe0), region = 44 }
   0xd   : > { %v366_v1 = vld [vmem:[%s914_s3] sm:$0xff]  ;;  %v791_v2 = vmov 0   ;;  %v494_v3 = vld [vmem:[#allocation2] sm:$0x1]  ;;  %s925_s23 = smov (!%p300_p4, %s781_s23), 1  ;;  %vm360_vm0 = vcmask 1043456  }
   0xe   : > { %749 = vset.pattern.permute.xlu0 %v791_v2  ;;  %750 = vset.pattern.permute.xlu1 %v791_v2  ;;  %s851_s28 = sshll.u32 %s925_s23, 4  ;;  %v460_v6 = vld [vmem:[%s915_s4] sm:$0xff]  ;;  %vm372_vm1 = vcmask 64512  }
   0xf   : > { %369 = vperm.xlu0 %749, %v366_v1   ;;  %497 = vperm.xlu1 %750, %v494_v3   ;;  %s307_s7 = scalar_lea.vmem %s911_s0, %s851_s28  ;;  %s317_s12 = scalar_lea.vmem %s912_s1, %s851_s28  ;;  %v365_v13 = vld [vmem:[%s913_s2] sm:$0xff] }
  0x10   : > { %v331_v4 = vld [vmem:[%s307_s7] sm:$0xff]  ;;  %v332_v5 = vld [vmem:[%s307_s7 + $0x8] sm:$0xff]  ;;  %s327_s17 = scalar_lea.vmem %s917_s6, %s851_s28 }
  0x11   : > { %335 = vst [vmem:[#allocation1] ss:$2 sm:$0xff] %v331_v4  ;;  %v864_v7 = vld [vmem:[%s317_s12] sm:$0xff]  ;;  %v866_v8 = vld [vmem:[%s317_s12 + $0x8] sm:$0xff] }
  0x12   : > { %337 = vst [vmem:[#allocation1 + $0x10] ss:$2 sm:$0xff] %v332_v5 }
  0x17   : > { %463 = vperm.xlu0 %749, %v460_v6  }
  0x18   : > { %v338_v9 = vld.sshfl [vmem:[#allocation1] sm:$0xff pattern:$0x75316420]  ;;  %v339_v10 = vld.sshfl [vmem:[#allocation1 + $0x8] sm:$0xff pattern:$0x75316420] }
  0x19   : > { %349 = vst [vmem:[#allocation1 + $0x1] ss:$2 sm:$0xff] %v864_v7  ;;  %v340_v11 = vld.sshfl [vmem:[#allocation1 + $0x10] sm:$0xff pattern:$0x75316420] }
  0x1a   : > { %v341_v12 = vld.sshfl [vmem:[#allocation1 + $0x18] sm:$0xff pattern:$0x75316420] }
  0x1b   : > { %351 = vst [vmem:[#allocation1 + $0x11] ss:$2 sm:$0xff] %v866_v8 }
  0x20   : > { %v352_v14 = vld.sshfl [vmem:[#allocation1] sm:$0xff pattern:$0x75316420]  ;;  %v353_v15 = vld.sshfl [vmem:[#allocation1 + $0x8] sm:$0xff pattern:$0x75316420] }
  0x21   : > { %v361_v16 = vsel %vm360_vm0, %v338_v9, %v352_v14  ;;  %v362_v17 = vsel %vm360_vm0, %v339_v10, %v353_v15 }
  0x22   : > { %391 = vmatpush.msra.mxu0 %v361_v16  ;;  %411 = vmatpush.msra.mxu1 %v362_v17  ;;  %v354_v18 = vld.sshfl [vmem:[#allocation1 + $0x10] sm:$0xff pattern:$0x75316420]  ;;  %v355_v19 = vld.sshfl [vmem:[#allocation1 + $0x18] sm:$0xff pattern:$0x75316420] }
  0x23   : > { %v363_v20 = vsel %vm360_vm0, %v340_v11, %v354_v18  ;;  %v364_v21 = vsel %vm360_vm0, %v341_v12, %v355_v19  ;;  %711 = vmatmul.msk.f32.vlgmr.msra.gmra.mxu0 %vm372_vm1, %v365_v13  ;;  %712 = vmatmul.msk.f32.vlgmr.msra.gmra.mxu1 %vm372_vm1, %v365_v13 }
  0x24   : > { %431 = vmatpush.msra.mxu2 %v363_v20  ;;  %451 = vmatpush.msra.mxu3 %v364_v21 }
  0x25   : > { %713 = vmatmul.msk.f32.vlgmr.msra.gmra.mxu2 %vm372_vm1, %v365_v13  ;;  %714 = vmatmul.msk.f32.vlgmr.msra.gmra.mxu3 %vm372_vm1, %v365_v13 }
  0x81   : > { %v370_v22 = vpop.permute.xlu0 %369  ;;  %v498_v44 = vpop.permute.xlu1 %497 }
  0x82   : > { %v500_v49 = vperm.slane %v498_v44, 0 }
  0x89   : > { %v464_v29 = vpop.permute.xlu0 %463 }
  0xa0   : > { %v393_v23 = vpop.f32.mrf.mxu0  ;;  %v413_v24 = vpop.f32.mrf.mxu1 }
  0xa1   : > { %v394_v25 = vadd.f32 %v393_v23, %v370_v22  ;;  %v414_v26 = vadd.f32 %v413_v24, %v370_v22 }
  0xa3   : > { %v456_v27 = vmax.f32 %v394_v25, 0.0  ;;  %v457_v28 = vmax.f32 %v414_v26, 0.0 }
  0xa5   : > { %v466_v30 = vmul.f32 %v464_v29, %v456_v27  ;;  %v467_v31 = vmul.f32 %v464_v29, %v457_v28 }
  0xa7   : > { %v470_v32 = vrot.slane %v466_v30, 4  ;;  %v476_v33 = vrot.slane %v467_v31, 4 }
  0xa8   : > { %v433_v34 = vpop.f32.mrf.mxu2  ;;  %v453_v35 = vpop.f32.mrf.mxu3 }
  0xa9   : > { %v471_v36 = vadd.f32 %v470_v32, %v466_v30  ;;  %v477_v37 = vadd.f32 %v476_v33, %v467_v31  ;;  %v434_v38 = vadd.f32 %v433_v34, %v370_v22  ;;  %v454_v39 = vadd.f32 %v453_v35, %v370_v22 }
  0xab   : > { %v472_v40 = vrot.slane %v471_v36, 2  ;;  %v478_v41 = vrot.slane %v477_v37, 2  ;;  %v458_v42 = vmax.f32 %v434_v38, 0.0  ;;  %v459_v43 = vmax.f32 %v454_v39, 0.0 }
  0xad   : > { %v473_v45 = vadd.f32 %v472_v40, %v471_v36  ;;  %v479_v46 = vadd.f32 %v478_v41, %v477_v37  ;;  %v468_v47 = vmul.f32 %v464_v29, %v458_v42  ;;  %v469_v48 = vmul.f32 %v464_v29, %v459_v43 }
  0xaf   : > { %v474_v50 = vrot.slane %v473_v45, 1  ;;  %v480_v51 = vrot.slane %v479_v46, 1  ;;  %v482_v52 = vrot.slane %v468_v47, 4  ;;  %v488_v53 = vrot.slane %v469_v48, 4 }
  0xb1   : > { %v475_v54 = vadd.f32 %v474_v50, %v473_v45  ;;  %v481_v55 = vadd.f32 %v480_v51, %v479_v46  ;;  %v483_v56 = vadd.f32 %v482_v52, %v468_v47  ;;  %v489_v57 = vadd.f32 %v488_v53, %v469_v48 }
  0xb3   : > { %v484_v58 = vrot.slane %v483_v56, 2  ;;  %v490_v59 = vrot.slane %v489_v57, 2  ;;  %v501_v60 = vadd.f32 %v500_v49, %v475_v54  ;;  %v502_v61 = vadd.f32 %v500_v49, %v481_v55 }
  0xb5   : > { %v485_v62 = vadd.f32 %v484_v58, %v483_v56  ;;  %v491_v63 = vadd.f32 %v490_v59, %v489_v57  ;;  %v715_v0 = vmul.f32 -1.442695, %v501_v60  ;;  %v716_v1 = vmul.f32 -1.442695, %v502_v61 }
  0xb7   : > { %v486_v2 = vrot.slane %v485_v62, 1  ;;  %v492_v3 = vrot.slane %v491_v63, 1  ;;  %751 = vpow2.f32 %v715_v0 }
  0xb8   : > { %753 = vpow2.f32 %v716_v1 }
  0xb9   : > { %v487_v4 = vadd.f32 %v486_v2, %v485_v62  ;;  %v493_v5 = vadd.f32 %v492_v3, %v491_v63 }
  0xbb   : > { %v503_v6 = vadd.f32 %v500_v49, %v487_v4  ;;  %v504_v9 = vadd.f32 %v500_v49, %v493_v5 }
  0xbd   : > { %v752_v10 = vpop.eup %751  ;;  %v717_v11 = vmul.f32 -1.442695, %v503_v6  ;;  %v718_v12 = vmul.f32 -1.442695, %v504_v9 }
  0xbe   : > { %v754_v13 = vpop.eup %753  ;;  %v517_v14 = vadd.f32 1.0, %v752_v10 }
  0xbf   : > { %755 = vpow2.f32 %v717_v11  ;;  %v518_v15 = vadd.f32 1.0, %v754_v13 }
  0xc0   : > { %757 = vpow2.f32 %v718_v12  ;;  %vm526_vm4 = vweird.f32 %v517_v14  ;;  %v532_v32 = vand.u32 2147483648, %v517_v14  ;;  %v530_v34 = vand.u32 2147483647, %v517_v14 }
  0xc1   : > { %759 = vrcp.f32 %v517_v14  ;;  %v545_v27 = vand.u32 2147483647, %v518_v15  ;;  %v547_v28 = vand.u32 2147483648, %v518_v15  ;;  %vm541_vm6 = vweird.f32 %v518_v15 }
  0xc2   : > { %761 = vrcp.f32 %v518_v15  ;;  %v533_v43 = vor.u32 1.1754944e-38, %v532_v32  ;;  %vm531_vm9 = vcmp.eq.f32.partialorder %v530_v34, 8.507059e+37 }
  0xc3   : > { %vm546_vm8 = vcmp.eq.f32.partialorder %v545_v27, 8.507059e+37  ;;  %v548_v38 = vor.u32 1.1754944e-38, %v547_v28 }
  0xc5   : > { %v756_v16 = vpop.eup %755 }
  0xc6   : > { %v758_v17 = vpop.eup %757  ;;  %v881_v18 = vadd.f32 1.0, %v756_v16 }
  0xc7   : > { %v760_v19 = vpop.eup %759  ;;  %v520_v20 = vadd.f32 1.0, %v758_v17 }
  0xc8   : > { %v762_v21 = vpop.eup %761  ;;  %v522_v22 = vmul.f32 %v760_v19, %v517_v14  ;;  %763 = vrcp.f32 %v881_v18  ;;  %vm527_vm2 = vweird.f32 %v760_v19  ;;  %vm556_vm12 = vweird.f32 %v881_v18 }
  0xc9   : > { %v537_v23 = vmul.f32 %v762_v21, %v518_v15  ;;  %765 = vrcp.f32 %v520_v20  ;;  %vm542_vm3 = vweird.f32 %v762_v21  ;;  %vm884_vm5 = vmor %vm526_vm4, %vm527_vm2  ;;  %v575_v49 = vand.u32 2147483647, %v520_v20 }
  0xca   : > { %v523_v24 = vsub.f32 1.0, %v522_v22  ;;  %vm543_vm7 = vmor %vm541_vm6, %vm542_vm3  ;;  %v577_v50 = vand.u32 2147483648, %v520_v20  ;;  %v562_v54 = vand.u32 2147483648, %v881_v18  ;;  %v560_v56 = vand.u32 2147483647, %v881_v18 }
  0xcb   : > { %v538_v25 = vsub.f32 1.0, %v537_v23  ;;  %vm571_vm14 = vweird.f32 %v520_v20  ;;  %vm576_vm1 = vcmp.eq.f32.partialorder %v575_v49, 8.507059e+37 }
  0xcc   : > { %v524_v26 = vmul.f32 %v760_v19, %v523_v24  ;;  %v578_v58 = vor.u32 1.1754944e-38, %v577_v50  ;;  %v563_v61 = vor.u32 1.1754944e-38, %v562_v54  ;;  %vm561_vm2 = vcmp.eq.f32.partialorder %v560_v56, 8.507059e+37 }
  0xcd   : > { %v539_v29 = vmul.f32 %v762_v21, %v538_v25 }
  0xce   : > { %v764_v30 = vpop.eup %763  ;;  %v525_v31 = vadd.f32 %v760_v19, %v524_v26 }
  0xcf   : > { %v540_v35 = vadd.f32 %v762_v21, %v539_v29  ;;  %v552_v36 = vmul.f32 %v764_v30, %v881_v18  ;;  %v766_v37 = vpop.eup %765  ;;  %vm557_vm10 = vweird.f32 %v764_v30 }
  0xd0   : > { %v529_v39 = vsel %vm884_vm5, %v760_v19, %v525_v31  ;;  %v567_v42 = vmul.f32 %v766_v37, %v520_v20  ;;  %vm572_vm11 = vweird.f32 %v766_v37  ;;  %vm558_vm13 = vmor %vm556_vm12, %vm557_vm10 }
  0xd1   : > { %v544_v40 = vsel %vm543_vm7, %v762_v21, %v540_v35  ;;  %v553_v41 = vsub.f32 1.0, %v552_v36  ;;  %v534_v48 = vsel %vm531_vm9, %v533_v43, %v529_v39  ;;  %vm573_vm15 = vmor %vm571_vm14, %vm572_vm11 }
  0xd2   : > { %v549_v44 = vsel %vm546_vm8, %v548_v38, %v544_v40  ;;  %v568_v46 = vsub.f32 1.0, %v567_v42 }
  0xd3   : > { %v554_v45 = vmul.f32 %v764_v30, %v553_v41  ;;  %v585_v47 = vrot.slane %v549_v44, 4 }
  0xd4   : > { %v569_v52 = vmul.f32 %v766_v37, %v568_v46 }
  0xd5   : > { %v555_v51 = vadd.f32 %v764_v30, %v554_v45  ;;  %v587_v53 = vsel %vm360_vm0, %v534_v48, %v585_v47 }
  0xd6   : > { %v591_v55 = vmul.f32 %v587_v53, %v864_v7  ;;  %v570_v57 = vadd.f32 %v766_v37, %v569_v52 }
  0xd7   : > { %v559_v59 = vsel %vm558_vm13, %v764_v30, %v555_v51 }
  0xd8   : > { %593 = vst [vmem:[%s327_s17] sm:$0xff] %v591_v55  ;;  %v574_v60 = vsel %vm573_vm15, %v766_v37, %v570_v57  ;;  %v564_v0 = vsel %vm561_vm2, %v563_v61, %v559_v59 }
  0xd9   : > { %v579_v62 = vsel %vm576_vm1, %v578_v58, %v574_v60 }
  0xda   : > { %v586_v63 = vrot.slane %v579_v62, 4 }
  0xdc   : > { %v588_v1 = vsel %vm360_vm0, %v564_v0, %v586_v63 }
  0xdd   : > { %v592_v7 = vmul.f32 %v588_v1, %v866_v8 }
  0xdf   : > { %594 = vst [vmem:[%s327_s17 + $0x8] sm:$0xff] %v592_v7 }
  0xe0 PF: > { %s18_s25 = sadd.s32 1, %s789_s25   ;;  %s920_s23 = smov %s785_s24 }
  0xe1   : > { %p15_p5 = scmp.ge.s32.totalorder %s18_s25, 4   ;;  %s921_s24 = smov %s923_s5 }
  0xe3   :  { %17 = sbr.rel (!%p15_p5) target bundleno = 3 (0x3), region = 80 }

</bundles_post_ra>
